<compile_context>
chip_gen: v7x
topology: tpu7x:2x2x1
jax: 0.10.0
libtpu: 0.0.40
codegen_flags: <defaults>
</compile_context>

<pallas_src>
import math
import numpy as np
import jax
import jax.numpy as jnp
from jax import lax
from jax.experimental import pallas as pl
from jax.experimental.pallas import tpu as pltpu


def _resize_crop_matrix(in_size: int, scale_size: int, out_size: int) -> np.ndarray:
    """W (out_size, in_size) s.t. W @ x == torch bilinear resize (align_corners=False)
    to `scale_size` followed by torchvision center-crop to `out_size`, along one axis."""
    crop_off = int(round((scale_size - out_size) / 2.0))      # torchvision CenterCrop offset
    dst = np.arange(out_size, dtype=np.float64) + crop_off    # coords in the resized image
    scale = in_size / scale_size
    src = scale * (dst + 0.5) - 0.5                           # align_corners=False
    src = np.maximum(src, 0.0)                                # PyTorch clamps negatives to 0
    i0 = np.minimum(np.floor(src).astype(np.int64), in_size - 1)
    i1 = np.minimum(i0 + 1, in_size - 1)
    lam = np.clip(src - i0, 0.0, 1.0)
    W = np.zeros((out_size, in_size), dtype=np.float32)
    rows = np.arange(out_size)
    np.add.at(W, (rows, i0), (1.0 - lam).astype(np.float32))
    np.add.at(W, (rows, i1), lam.astype(np.float32))
    return W


def _make_kernel(TN, C, H_in, W_in, out_h, out_w, width_first, compute_dtype):
    def kernel(x_ref, wy_ref, wxt_ref, scale_ref, bias_ref, o_ref):
        wy = wy_ref[...]       # (out_h, H_in)  compute dtype, grid-invariant
        wxt = wxt_ref[...]     # (W_in, out_w)  compute dtype, grid-invariant

        if width_first:
            # ONE fused MXU matmul over every row of every plane in the block:
            # (TN*C*H_in, W_in) @ (W_in, out_w).  Leading-dim reshapes are free; the
            # dtype cast happens in VMEM (input stays u8/f32 in HBM).
            x2 = x_ref[...].reshape(TN * C * H_in, W_in).astype(compute_dtype)
            a = jnp.dot(x2, wxt, preferred_element_type=compute_dtype)
            a4 = a.reshape(TN, C, H_in, out_w)

        for tn in range(TN):
            for c in range(C):
                s = scale_ref[c]           # SMEM scalar -> VPU splat (no VMEM broadcast)
                b = bias_ref[c]
                if width_first:
                    # per-plane height resize: (out_h, H_in) @ (H_in, out_w), f32 acc
                    r = jnp.dot(wy, a4[tn, c], preferred_element_type=jnp.float32)
                else:
                    plane = x_ref[tn, c].astype(compute_dtype)              # (H_in, W_in)
                    t = jnp.dot(wy, plane, preferred_element_type=compute_dtype)
                    r = jnp.dot(t, wxt, preferred_element_type=jnp.float32)
                # Fused Normalize: (x - mean)/std == x*(1/std) + (-mean/std), scalar FMA.
                o_ref[tn, c] = (r * s + b).astype(o_ref.dtype)

    return kernel


def center_crop_transform(x, image_size, mean, std, crop_pct: float = 0.875,
                          compute_dtype=jnp.bfloat16, out_dtype=jnp.float32):
    """x: (N, C, H_in, W_in) float32 in [0, 1] OR uint8 in [0, 255].
    Returns (N, C, out_h, out_w) `out_dtype`."""
    N, C, H_in, W_in = x.shape
    if isinstance(image_size, (tuple, list)):
        scale_size = [int(s / crop_pct) for s in image_size]
        out_h, out_w = image_size
    else:
        scale_size = [int(math.floor(image_size / crop_pct))] * 2
        out_h = out_w = int(image_size)
    sh, sw = scale_size

    cdtype = jnp.dtype(compute_dtype)
    odtype = jnp.dtype(out_dtype)
    x_item = jnp.dtype(x.dtype).itemsize
    cd_size = cdtype.itemsize
    out_item = odtype.itemsize

    # Interpolation matrices.  ConvertImageDtype's 1/255 for uint8 inputs is folded
    # into wy (wy is applied exactly once per pixel regardless of contraction order).
    wy_np = _resize_crop_matrix(H_in, sh, out_h)                       # (out_h, H_in)
    if jnp.dtype(x.dtype) == jnp.uint8:
        wy_np = wy_np * np.float32(1.0 / 255.0)
    wy = jnp.asarray(wy_np, dtype=cdtype)
    wxt = jnp.asarray(_resize_crop_matrix(W_in, sw, out_w).T, dtype=cdtype)  # (W_in, out_w)

    # Per-channel affine as SMEM scalars.
    mean_np = np.asarray(mean, dtype=np.float32).reshape(C)
    std_np = np.asarray(std, dtype=np.float32).reshape(C)
    scale = jnp.asarray(1.0 / std_np)                                  # (C,)
    bias = jnp.asarray(-mean_np / std_np)                              # (C,)

    # Contraction order by FLOPs (width-first wins ties: it allows the fused matmul).
    cost_h_first = out_h * W_in * (H_in + out_w)
    cost_w_first = H_in * out_w * (W_in + out_h)
    width_first = cost_w_first <= cost_h_first

    # VMEM budget from the actual hardware (fallback = v7x-safe 64 MiB).
    try:
        vmem_cap = int(pltpu.get_tpu_info().vmem_capacity_bytes)
    except Exception:  # pragma: no cover - conservative fallback
        vmem_cap = 64 * 1024 * 1024
    vmem_limit = min(64 * 1024 * 1024, max(32 * 1024 * 1024, int(0.62 * vmem_cap)))
    budget = int(0.85 * vmem_limit)

    def per_step_bytes(tn):
        in_blk = tn * C * H_in * W_in * x_item
        out_blk = tn * C * out_h * out_w * out_item
        if width_first:
            cast_copy = tn * C * H_in * W_in * cd_size if jnp.dtype(x.dtype) != cdtype else 0
            inter = tn * C * H_in * out_w * cd_size        # fused width-resize result
        else:
            cast_copy = H_in * W_in * cd_size              # one plane at a time
            inter = out_h * W_in * cd_size                 # per-plane height result
        weights = 2 * (out_h * H_in + W_in * out_w) * cd_size   # double-buffered residents
        plane_tmp = 2 * out_h * out_w * 4                       # r + normalize temp (f32)
        return 2 * in_blk + 2 * out_blk + cast_copy + inter + weights + plane_tmp + (1 << 20)

    divisors = [d for d in range(1, N + 1) if N % d == 0]
    fits = [d for d in divisors if per_step_bytes(d) <= budget] or [1]
    even_grid = [d for d in fits if (N // d) % 2 == 0]     # balance v7x's two TensorCores
    multi_grid = [d for d in fits if (N // d) >= 2]
    TN = max(even_grid or multi_grid or fits)
    grid = (N // TN,)

    flops_per_plane = 2 * (cost_w_first if width_first else cost_h_first)
    cost = pl.CostEstimate(
        flops=int(N * C * flops_per_plane),
        transcendentals=0,
        bytes_accessed=int(N * C * (H_in * W_in * x_item + out_h * out_w * out_item)
                           + (out_h * H_in + W_in * out_w) * cd_size + 2 * C * 4),
    )

    kernel = _make_kernel(TN, C, H_in, W_in, out_h, out_w, width_first, cdtype)

    return pl.pallas_call(
        kernel,
        out_shape=jax.ShapeDtypeStruct((N, C, out_h, out_w), odtype),
        grid=grid,
        in_specs=[
            pl.BlockSpec((TN, C, H_in, W_in), lambda n: (n, 0, 0, 0)),   # image block (storage dtype)
            pl.BlockSpec((out_h, H_in), lambda n: (0, 0)),               # Wy   (resident)
            pl.BlockSpec((W_in, out_w), lambda n: (0, 0)),               # Wx^T (resident)
            pl.BlockSpec(memory_space=pltpu.MemorySpace.SMEM),           # scale (C,) scalars
            pl.BlockSpec(memory_space=pltpu.MemorySpace.SMEM),           # bias  (C,) scalars
        ],
        out_specs=pl.BlockSpec((TN, C, out_h, out_w), lambda n: (n, 0, 0, 0)),
        compiler_params=pltpu.CompilerParams(
            dimension_semantics=("parallel",),
            vmem_limit_bytes=int(vmem_limit)),
        cost_estimate=cost,
    )(x, wy, wxt, scale, bias)


def _reference(x, image_size, mean, std, crop_pct=0.875):
    """Pure-JAX reference using the same separable formulation (full f32 precision)."""
    N, C, H_in, W_in = x.shape
    out_h, out_w = image_size
    sh, sw = [int(s / crop_pct) for s in image_size]
    wy = jnp.asarray(_resize_crop_matrix(H_in, sh, out_h))
    wx = jnp.asarray(_resize_crop_matrix(W_in, sw, out_w))
    r = jnp.einsum("oh,nchw->ncow", wy, x.astype(jnp.float32),
                   precision=lax.Precision.HIGHEST)
    r = jnp.einsum("pw,ncow->ncop", wx, r, precision=lax.Precision.HIGHEST)
    mean_a = jnp.asarray(mean, jnp.float32).reshape(1, C, 1, 1)
    std_a = jnp.asarray(std, jnp.float32).reshape(1, C, 1, 1)
    return (r - mean_a) / std_a


if __name__ == "__main__":
    key = jax.random.PRNGKey(0)
    N, C, H, W = 2, 3, 24, 24
    image_size = (16, 16)                         # scale_size -> (18, 18) with crop_pct=0.875
    mean = (0.485, 0.456, 0.406)
    std = (0.229, 0.224, 0.225)

    x = jax.random.uniform(key, (N, C, H, W), dtype=jnp.float32)   # image in [0, 1]
    ref = jax.block_until_ready(_reference(x, image_size, mean, std))

    # f32 compute path (near-exact)
    out_f32 = jax.block_until_ready(
        center_crop_transform(x, image_size, mean, std, compute_dtype=jnp.float32))
    assert out_f32.shape == (N, C, image_size[0], image_size[1]), out_f32.shape
    np.testing.assert_allclose(np.asarray(out_f32), np.asarray(ref), rtol=1e-5, atol=3e-5)

    # default bf16 compute path (v6e/v7x native MXU dtype): preprocessing-grade precision.
    out_bf16 = jax.block_until_ready(center_crop_transform(x, image_size, mean, std))
    np.testing.assert_allclose(np.asarray(out_bf16), np.asarray(ref), rtol=0.0, atol=1e-1)

    # uint8 ingestion path (ConvertImageDtype 1/255 folded into wy, cast in-kernel).
    x_u8 = jnp.round(x * 255.0).astype(jnp.uint8)
    ref_u8 = jax.block_until_ready(
        _reference(x_u8.astype(jnp.float32) / 255.0, image_size, mean, std))
    out_u8 = jax.block_until_ready(
        center_crop_transform(x_u8, image_size, mean, std, compute_dtype=jnp.float32))
    np.testing.assert_allclose(np.asarray(out_u8), np.asarray(ref_u8), rtol=1e-5, atol=3e-5)

    print("KERNEL_OK")
</pallas_src>

<mosaic_0001>
module attributes {stable_mosaic.version = 11 : i64} {
  func.func @kernel(%arg0: i32, %arg1: memref<1x3x24x24xf32, #tpu.memory_space<vmem>>, %arg2: memref<16x24xf32, #tpu.memory_space<vmem>>, %arg3: memref<24x16xf32, #tpu.memory_space<vmem>>, %arg4: memref<3xf32, #tpu.memory_space<smem>>, %arg5: memref<3xf32, #tpu.memory_space<smem>>, %arg6: memref<1x3x16x16xf32, #tpu.memory_space<vmem>>) attributes {dimension_semantics = [#tpu.dimension_semantics<parallel>], iteration_bounds = array<i64: 2>, scalar_prefetch = 0 : i64, scratch_operands = 0 : i64, tpu.core_type = #tpu.core_type<tc>, window_params = [{transform_indices = @transform_0, window_bounds = array<i64: 1, 3, 24, 24>}, {pipeline_mode = #tpu.pipeline_mode<synchronous>, transform_indices = @transform_1, window_bounds = array<i64: 16, 24>}, {pipeline_mode = #tpu.pipeline_mode<synchronous>, transform_indices = @transform_2, window_bounds = array<i64: 24, 16>}, {transform_indices = @transform_3, window_bounds = array<i64: 3>}, {transform_indices = @transform_4, window_bounds = array<i64: 3>}, {transform_indices = @transform_5, window_bounds = array<i64: 1, 3, 16, 16>}]} {
    %c0 = arith.constant 0 : index
    %c0_0 = arith.constant 0 : index
    %0 = vector.load %arg2[%c0, %c0_0] : memref<16x24xf32, #tpu.memory_space<vmem>>, vector<16x24xf32>
    %c0_1 = arith.constant 0 : index
    %c0_2 = arith.constant 0 : index
    %1 = vector.load %arg3[%c0_1, %c0_2] : memref<24x16xf32, #tpu.memory_space<vmem>>, vector<24x16xf32>
    %c0_3 = arith.constant 0 : index
    %c0_4 = arith.constant 0 : index
    %c0_5 = arith.constant 0 : index
    %c0_6 = arith.constant 0 : index
    %2 = vector.load %arg1[%c0_3, %c0_4, %c0_5, %c0_6] : memref<1x3x24x24xf32, #tpu.memory_space<vmem>>, vector<1x3x24x24xf32>
    %3 = vector.shape_cast %2 : vector<1x3x24x24xf32> to vector<72x24xf32>
    %cst = arith.constant dense<0.000000e+00> : vector<72x16xf32>
    %4 = tpu.matmul %3, %1, %cst {dimension_numbers = #tpu.dot_dimension_numbers<[1], [0], [0], [1], [0, 0, 1, 1], [], []>} : vector<72x24xf32>, vector<24x16xf32>, vector<72x16xf32> -> vector<72x16xf32>
    %5 = vector.shape_cast %4 : vector<72x16xf32> to vector<1x3x24x16xf32>
    %c0_7 = arith.constant 0 : index
    %6 = memref.load %arg4[%c0_7] : memref<3xf32, #tpu.memory_space<smem>>
    %c0_8 = arith.constant 0 : index
    %7 = memref.load %arg5[%c0_8] : memref<3xf32, #tpu.memory_space<smem>>
    %8 = vector.extract_strided_slice %5 {offsets = [0, 0, 0, 0], sizes = [1, 1, 24, 16], strides = [1, 1, 1, 1]} : vector<1x3x24x16xf32> to vector<1x1x24x16xf32>
    %9 = vector.shape_cast %8 : vector<1x1x24x16xf32> to vector<24x16xf32>
    %cst_9 = arith.constant dense<0.000000e+00> : vector<16x16xf32>
    %10 = tpu.matmul %0, %9, %cst_9 {dimension_numbers = #tpu.dot_dimension_numbers<[1], [0], [0], [1], [0, 0, 1, 1], [], []>} : vector<16x24xf32>, vector<24x16xf32>, vector<16x16xf32> -> vector<16x16xf32>
    %11 = vector.broadcast %6 : f32 to vector<16x16xf32>
    %12 = arith.mulf %10, %11 : vector<16x16xf32>
    %13 = vector.broadcast %7 : f32 to vector<16x16xf32>
    %14 = arith.addf %12, %13 : vector<16x16xf32>
    %c0_10 = arith.constant 0 : index
    %c0_11 = arith.constant 0 : index
    %c0_12 = arith.constant 0 : index
    %c0_13 = arith.constant 0 : index
    %15 = vector.load %arg6[%c0_10, %c0_11, %c0_12, %c0_13] : memref<1x3x16x16xf32, #tpu.memory_space<vmem>>, vector<1x1x16x16xf32>
    %16 = vector.shape_cast %15 : vector<1x1x16x16xf32> to vector<16x16xf32>
    %17 = vector.shape_cast %14 : vector<16x16xf32> to vector<1x1x16x16xf32>
    tpu.vector_store %arg6[%c0_10, %c0_11, %c0_12, %c0_13], %17 {strides = array<i32>} : memref<1x3x16x16xf32, #tpu.memory_space<vmem>>, vector<1x1x16x16xf32>,
    %c1 = arith.constant 1 : index
    %18 = memref.load %arg4[%c1] : memref<3xf32, #tpu.memory_space<smem>>
    %c1_14 = arith.constant 1 : index
    %19 = memref.load %arg5[%c1_14] : memref<3xf32, #tpu.memory_space<smem>>
    %20 = vector.extract_strided_slice %5 {offsets = [0, 1, 0, 0], sizes = [1, 1, 24, 16], strides = [1, 1, 1, 1]} : vector<1x3x24x16xf32> to vector<1x1x24x16xf32>
    %21 = vector.shape_cast %20 : vector<1x1x24x16xf32> to vector<24x16xf32>
    %cst_15 = arith.constant dense<0.000000e+00> : vector<16x16xf32>
    %22 = tpu.matmul %0, %21, %cst_15 {dimension_numbers = #tpu.dot_dimension_numbers<[1], [0], [0], [1], [0, 0, 1, 1], [], []>} : vector<16x24xf32>, vector<24x16xf32>, vector<16x16xf32> -> vector<16x16xf32>
    %23 = vector.broadcast %18 : f32 to vector<16x16xf32>
    %24 = arith.mulf %22, %23 : vector<16x16xf32>
    %25 = vector.broadcast %19 : f32 to vector<16x16xf32>
    %26 = arith.addf %24, %25 : vector<16x16xf32>
    %c0_16 = arith.constant 0 : index
    %c1_17 = arith.constant 1 : index
    %c0_18 = arith.constant 0 : index
    %c0_19 = arith.constant 0 : index
    %27 = vector.load %arg6[%c0_16, %c1_17, %c0_18, %c0_19] : memref<1x3x16x16xf32, #tpu.memory_space<vmem>>, vector<1x1x16x16xf32>
    %28 = vector.shape_cast %27 : vector<1x1x16x16xf32> to vector<16x16xf32>
    %29 = vector.shape_cast %26 : vector<16x16xf32> to vector<1x1x16x16xf32>
    tpu.vector_store %arg6[%c0_16, %c1_17, %c0_18, %c0_19], %29 {strides = array<i32>} : memref<1x3x16x16xf32, #tpu.memory_space<vmem>>, vector<1x1x16x16xf32>,
    %c2 = arith.constant 2 : index
    %30 = memref.load %arg4[%c2] : memref<3xf32, #tpu.memory_space<smem>>
    %c2_20 = arith.constant 2 : index
    %31 = memref.load %arg5[%c2_20] : memref<3xf32, #tpu.memory_space<smem>>
    %32 = vector.extract_strided_slice %5 {offsets = [0, 2, 0, 0], sizes = [1, 1, 24, 16], strides = [1, 1, 1, 1]} : vector<1x3x24x16xf32> to vector<1x1x24x16xf32>
    %33 = vector.shape_cast %32 : vector<1x1x24x16xf32> to vector<24x16xf32>
    %cst_21 = arith.constant dense<0.000000e+00> : vector<16x16xf32>
    %34 = tpu.matmul %0, %33, %cst_21 {dimension_numbers = #tpu.dot_dimension_numbers<[1], [0], [0], [1], [0, 0, 1, 1], [], []>} : vector<16x24xf32>, vector<24x16xf32>, vector<16x16xf32> -> vector<16x16xf32>
    %35 = vector.broadcast %30 : f32 to vector<16x16xf32>
    %36 = arith.mulf %34, %35 : vector<16x16xf32>
    %37 = vector.broadcast %31 : f32 to vector<16x16xf32>
    %38 = arith.addf %36, %37 : vector<16x16xf32>
    %c0_22 = arith.constant 0 : index
    %c2_23 = arith.constant 2 : index
    %c0_24 = arith.constant 0 : index
    %c0_25 = arith.constant 0 : index
    %39 = vector.load %arg6[%c0_22, %c2_23, %c0_24, %c0_25] : memref<1x3x16x16xf32, #tpu.memory_space<vmem>>, vector<1x1x16x16xf32>
    %40 = vector.shape_cast %39 : vector<1x1x16x16xf32> to vector<16x16xf32>
    %41 = vector.shape_cast %38 : vector<16x16xf32> to vector<1x1x16x16xf32>
    tpu.vector_store %arg6[%c0_22, %c2_23, %c0_24, %c0_25], %41 {strides = array<i32>} : memref<1x3x16x16xf32, #tpu.memory_space<vmem>>, vector<1x1x16x16xf32>,
    return
  }
  func.func @transform_0(%arg0: i32) -> (i32, i32, i32, i32) {
    %c0_i32 = arith.constant 0 : i32
    %c0_i32_0 = arith.constant 0 : i32
    %c0_i32_1 = arith.constant 0 : i32
    %c0_i32_2 = arith.constant 0 : i32
    return %arg0, %c0_i32, %c0_i32_0, %c0_i32_1 : i32, i32, i32, i32
  }
  func.func @transform_1(%arg0: i32) -> (i32, i32) {
    %c0_i32 = arith.constant 0 : i32
    %c0_i32_0 = arith.constant 0 : i32
    %c0_i32_1 = arith.constant 0 : i32
    return %c0_i32, %c0_i32_0 : i32, i32
  }
  func.func @transform_2(%arg0: i32) -> (i32, i32) {
    %c0_i32 = arith.constant 0 : i32
    %c0_i32_0 = arith.constant 0 : i32
    %c0_i32_1 = arith.constant 0 : i32
    return %c0_i32, %c0_i32_0 : i32, i32
  }
  func.func @transform_3(%arg0: i32) -> i32 {
    %c0_i32 = arith.constant 0 : i32
    %c0_i32_0 = arith.constant 0 : i32
    return %c0_i32 : i32
  }
  func.func @transform_4(%arg0: i32) -> i32 {
    %c0_i32 = arith.constant 0 : i32
    %c0_i32_0 = arith.constant 0 : i32
    return %c0_i32 : i32
  }
  func.func @transform_5(%arg0: i32) -> (i32, i32, i32, i32) {
    %c0_i32 = arith.constant 0 : i32
    %c0_i32_0 = arith.constant 0 : i32
    %c0_i32_1 = arith.constant 0 : i32
    %c0_i32_2 = arith.constant 0 : i32
    return %arg0, %c0_i32, %c0_i32_0, %c0_i32_1 : i32, i32, i32, i32
  }
}

</mosaic_0001>

<bundles_post_ra>
// kernel: tpu_custom_call.1
= control target key start
LH: loop header
LB: loop body
LE: loop exit
PB: predicated region body
PF: predicated region fallthrough
CT: control target
= control target key end

     0   :  { %10 = vsyncpa [#allocation3], 0  ;;  %s1453_s0 = inlined_call_operand.hbm [shape: f32[2,3,24,24], index: 0, kind: input, shape index: {}]   ;;  %s1454_s1 = inlined_call_operand.vmem [shape: f32[16,24], index: 1, kind: input, shape index: {}]   ;;  %s1455_s2 = inlined_call_operand.vmem [shape: f32[24,16], index: 2, kind: input, shape index: {}]   ;;  %s1456_s3 = inlined_call_operand.vmem [shape: f32[3], index: 3, kind: input, shape index: {}]   ;;  %s1457_s4 = inlined_call_operand.vmem [shape: f32[3], index: 4, kind: input, shape index: {}]   ;;  %s1458_s5 = inlined_call_operand.hbm [shape: f32[2,3,16,16], index: 5, kind: output, shape index: {}]  }
   0x1   :  { %12 = vsyncpa [#allocation3 + $0x1], 0 }
   0x2   :  { %13 = vsyncpa [#allocation5], 0 }
   0x3   :  { %14 = vsyncpa [#allocation8], 0 }
   0x4   :  { %15 = vsyncpa [#allocation4], 0 }
   0x5   :  { %17 = vsyncpa [#allocation4 + $0x1], 0  ;;  %s1192_s18 = smov 0   ;;  %s1194_s19 = smov 0  }
   0x6   :  { %s1196_s20 = smov 0   ;;  %s1198_s21 = smov 0  }
   0x7 LB: > { %s1213_s22 = sadd.s32 4294967295, %s1149_s21   ;;  %s795_s23 = sadd.s32 4294967294, %s1149_s21   ;;  %s1149_s21 = sphi %s1198_s21, %s1484_s21   ;;  %s1145_s20 = sphi %s1196_s20, %s1483_s20   ;;  %s1141_s19 = sphi %s1194_s19, %s1482_s19   ;;  %s1137_s18 = sphi %s1192_s18, %s1481_s18  }
   0x8   : > { %s1217_s24 = sadd.s32 1, %s1149_s21   ;;  %s30_s25 = sadd.s32 1, %s1145_s20 }
   0x9   : > { %s27_s26 = ssub.s32 %s1149_s21, %s1217_s24  ;;  %p37_p0 = scmp.ne.s32.totalorder %s1145_s20, %s1141_s19 }
   0xa   : > { %p28_p1 = scmp.eq.s32.totalorder %s27_s26, 0  ;;  %p38_p2 = scmp.eq.s32.totalorder %s1149_s21, 0 }
   0xb   : > { %p43_p3 = scmp.ne.s32.totalorder %s1141_s19, %s1137_s18  ;;  %p1459_p4 = scmp.eq.s32.totalorder %s1213_s22, 0 }
   0xc   : > { %s1229_s27 = scalar_select %p28_p1, %s1145_s20, %s30_s25  }
   0xd   : > { %p1231_p5 = por %p38_p2, %p37_p0  ;;  %p1237_p6 = por %p1459_p4, %p43_p3 }
   0xe   : > { %p151_p7 = scmp.eq.s32.totalorder %s1213_s22, 1  ;;  %p157_p8 = scmp.eq.s32.totalorder %s795_s23, 1 }
   0xf   : > { %s1465_s29 = scalar_select %p1237_p6, 1, 0 }
  0x10   : > { %p796_p9 = scmp.ge.s32.totalorder %s1149_s21, 1  ;;  %p164_p10 = scmp.lt.s32.totalorder %s1149_s21, 3 }
  0x11   : > { %p1244_p11 = por %p151_p7, %p37_p0  ;;  %p1248_p12 = por %p157_p8, %p43_p3 }
  0x12   : > { %p1252_p13 = pnand %p796_p9, %p164_p10  ;;  %s183_s10 = sshll.u32 %s1456_s3, 4  ;;  %s184_s10 = int_to_ptr.vmem [resolvable:$true] %s183_s10 }
  0x13   : > { %s1466_s30 = scalar_select %p1244_p11, 1, 0 }
  0x14   : > { %s1467_s6 = scalar_select %p1248_p12, 1, 0 }
  0x15   : > { %s1468_s7 = scalar_select %p1252_p13, 1, 0 }
  0x16   : > { %p953_p1 = pneg %p1252_p13  ;;  %p970_p2 = scmp.lt.s32.totalorder %s1149_s21, 2 }
  0x17   : > { %s194_s14 = sshll.u32 %s1457_s4, 4  ;;  %s1015_s16 = scalar_lea.vmem %s184_s10, 16  ;;  %s195_s14 = int_to_ptr.vmem [resolvable:$true] %s194_s14 }
  0x18   : > { %p1265_p7 = pnand %p953_p1, %p1459_p4  ;;  %p1274_p3 = pnand %p970_p2, %p1231_p5 }
  0x19   : > { %p1016_p8 = scmp.ne.s32.totalorder %s184_s10, %s1015_s16  ;;  %p1023_p0 = scmp.lt.s32.totalorder %s184_s10, %s184_s10 }
  0x1a   : > { %s1470_s15 = scalar_select %p1274_p3, 1, 0 }
  0x1b   : > { %p1017_p9 = pneg %p1265_p7  ;;  %p1024_p4 = scmp.lt.s32.totalorder %s1015_s16, %s1015_s16 }
  0x1d   : > { %p1018_p10 = pnand %p1017_p9, %p1016_p8  ;;  %p1025_p12 = por %p1024_p4, %p1023_p0 }
  0x1f   : > { %p1019_p1 = pneg %p1018_p10 }
  0x21   : > { %p1026_p11 = pnand %p1025_p12, %p1019_p1 }
  0x23   : > { %1029 = shalt.err (!%p1026_p11)
}
  0x24   : > { %s1151_s17 = smov [#allocation6]   ;;  %s205_s23 = sand.u32 1, %s1145_s20  }
  0x25   : > { %956 = dma.vmem_to_smem (!%p1265_p7), %s184_s10, 16, %s1151_s17, [#allocation5]  }
  0x26   : > { %s1030_s25 = scalar_lea.vmem %s195_s14, 16  ;;  %p1038_p8 = scmp.lt.s32.totalorder %s195_s14, %s195_s14 }
  0x27   : > { %p1031_p5 = scmp.ne.s32.totalorder %s195_s14, %s1030_s25  ;;  %p1039_p10 = scmp.lt.s32.totalorder %s1030_s25, %s1030_s25 }
  0x29   : > { %p1033_p2 = pnand %p1031_p5, %p1017_p9  ;;  %p1040_p13 = por %p1039_p10, %p1038_p8 }
  0x2b   : > { %p1034_p6 = pneg %p1033_p2 }
  0x2d   : > { %p1041_p3 = pnand %p1040_p13, %p1034_p6 }
  0x2f   : > { %1044 = shalt.err (!%p1041_p3)
}
  0x30   : > { %s1152_s26 = smov [#allocation7]   ;;  %s936_s28 = smul.u32 72, %s205_s23 }
  0x31   : > { %959 = dma.vmem_to_smem (!%p1265_p7), %s195_s14, 16, %s1152_s26, [#allocation8]  }
  0x32   : > { %s937_s8 = smul.u32 1152, %s1149_s21  ;;  %s209_s13 = scalar_lea.vmem [#allocation2], %s936_s28 }
  0x33   : > { %s216_s16 = sshll.u32 %s209_s13, 4  ;;  %s1299_s11 = scalar_lea.sflag [#allocation3], %s205_s23  ;;  %s1297_s16 = int_to_ptr.vmem [resolvable:$true] %s216_s16 }
  0x34   : > { %s1295_s12 = scalar_lea.hbm %s1453_s0, %s937_s8  ;;  %p1471_p6 = scmp.ne.s32.totalorder %s1470_s15, 0 }
  0x35   : > { %s1045_s17 = scalar_lea.hbm %s1295_s12, 1152  ;;  %s1050_s26 = scalar_lea.hbm %s1453_s0, 2304 }
  0x36   : > { %p1046_p4 = scmp.ne.s32.totalorder %s1295_s12, %s1045_s17  ;;  %p1047_p11 = pneg %p1471_p6 }
  0x37   : > { %p1051_p0 = scmp.lt.u32.totalorder %s1295_s12, %s1453_s0  ;;  %p1052_p7 = scmp.lt.u32.totalorder %s1050_s26, %s1045_s17 }
  0x38   : > { %p1048_p12 = pnand %p1047_p11, %p1046_p4  ;;  %p1054_p9 = scmp.lt.u32.totalorder %s1045_s17, %s1295_s12 }
  0x39   : > { %p1053_p3 = por %p1052_p7, %p1051_p0 }
  0x3a   : > { %p1049_p13 = pneg %p1048_p12 }
  0x3b   : > { %p1055_p1 = por %p1054_p9, %p1053_p3 }
  0x3d   : > { %p1056_p5 = pnand %p1055_p1, %p1049_p13 }
  0x3f   : > { %1059 = shalt.err (!%p1056_p5)
}
  0x40   : > { %s1060_s23 = scalar_lea.vmem %s1297_s16, 1152  ;;  %s1153_s28 = smov [#allocation2]  }
  0x41   : > { %p1061_p2 = scmp.ne.s32.totalorder %s1297_s16, %s1060_s23  ;;  %s1065_s10 = sshll.u32 %s1153_s28, 4  ;;  %s1066_s10 = int_to_ptr.vmem [resolvable:$false] %s1065_s10 }
  0x42   : > { %s1067_s13 = scalar_lea.vmem %s1066_s10, 2304  ;;  %p1068_p4 = scmp.lt.s32.totalorder %s1297_s16, %s1066_s10 }
  0x43   : > { %p1063_p8 = pnand %p1061_p2, %p1047_p11  ;;  %p1069_p12 = scmp.lt.s32.totalorder %s1067_s13, %s1060_s23 }
  0x45   : > { %p1064_p10 = pneg %p1063_p8  ;;  %p1070_p0 = por %p1069_p12, %p1068_p4 }
  0x47   : > { %p1071_p7 = pnand %p1070_p0, %p1064_p10 }
  0x49   : > { %1074 = shalt.err (!%p1071_p7)
}
  0x4a   : > { %s1154_s17 = smov 128   ;;  %s1155_s14 = smov 8  }
  0x4b   : > { %963 = dma.hbm_to_vmem [thread:$0]  (!%p1471_p6), %s1295_s12, 1152, %s1297_s16, %s1299_s11, %s1154_s17, %s1154_s17, %s1155_s14  }
  0x4c   : > { %p1472_p11 = scmp.ne.s32.totalorder %s1468_s7, 0 }
  0x4d   : > { %s1330_s25 = sand.u32 (!%p1472_p11), 1, %s1141_s19   ;;  %p1473_p13 = scmp.ne.s32.totalorder (!%p1472_p11), %s1465_s29, 0 }
  0x4e   : > { %228 = sbr.rel (%p1472_p11) target bundleno = 579 (0x243), region = 40  ;;  %s231_s8 = scalar_lea.sflag (!%p1472_p11), [#allocation3], %s1330_s25 }
  0x4f   : > { %s938_s26 = smul.u32 (!%p1472_p11), 72, %s1330_s25 }
  0x51   : > { %s1334_s9 = scalar_lea.vmem (!%p1472_p11), [#allocation2], %s938_s26 }
  0x55   : > { %1120 = dma.done.wait (%p1473_p13), %s231_s8, 1152  }
  0x56   : > { %1122 = vsyncadd (%p1473_p13), %s231_s8, 4294966144  ;;  %p1474_p6 = scmp.eq.s32.totalorder %s1213_s22, 0 }
  0x58   : > { %1124 = dma.done.wait (%p1474_p6), [#allocation5], 16   ;;  %p1475_p3 = pmov %p1474_p6 }
  0x5a   : > { %1126 = vsyncadd (%p1475_p3), [#allocation5], 4294967280  ;;  %p1476_p9 = pmov %p1475_p3 }
  0x5b   : > { %p1477_p1 = pmov %p1475_p3 }
  0x5c   : > { %1128 = dma.done.wait (%p1476_p9), [#allocation8], 16  }
  0x5d   : > { %1130 = vsyncadd (%p1477_p1), [#allocation8], 4294967280 }
  0x5e   : > { %247 = sfence }
  0x5f   : > { %v272_v0 = vld [vmem:[%s1455_s2] sm:$0xff]  ;;  %v273_v1 = vld [vmem:[%s1455_s2 + $0x8] sm:$0xff]  ;;  %v1156_v2 = vmov 0.0|0.0   ;;  %vm1157_vm0 = vmmov 0   ;;  %v1158_v4 = vmov 0.0   ;;  %v274_v5 = vld [vmem:[%s1455_s2 + $0x10] sm:$0xff] }
  0x60   : > { %917 = vmatprep.subr.bf16.mxu0 %v1156_v2  ;;  %v918_v3 = vpack.c.bf16 %v273_v1, %v272_v0  ;;  %863 = vmatprep.mubr.msk.f32.mxu0 %vm1157_vm0, %v1158_v4  ;;  %v275_v6 = vld [vmem:[%s1334_s9] sm:$0xff]  ;;  %vm284_vm1 = vcmask 195584   ;;  %v282_v7 = vld [vmem:[%s1334_s9 + $0x38] sm:$0xff]  ;;  %v276_v8 = vld [vmem:[%s1334_s9 + $0x8] sm:$0xff]  ;;  %s422_s17 = sld [smem:[#allocation6]]  ;;  %s939_s26 = smul.u32 48, %s1330_s25 }
  0x61   : > { %932 = vmatprep.subr.bf16.mxu1 %v1156_v2  ;;  %884 = vmatprep.mubr.msk.f32.mxu1 %vm1157_vm0, %v1158_v4  ;;  %v283_v9 = vld [vmem:[%s1334_s9 + $0x40] sm:$0xff]  ;;  %v277_v10 = vld [vmem:[%s1334_s9 + $0x10] sm:$0xff]  ;;  %v278_v11 = vld [vmem:[%s1334_s9 + $0x18] sm:$0xff]  ;;  %s423_s14 = sld [smem:[#allocation7]]  ;;  %vm511_vm2 = vcmask 130048   ;;  %s815_s8 = sld [smem:[#allocation6 + $0x1]] }
  0x62   : > { %919 = vmatpush3.bf16.msra.mxu0 %v918_v3  ;;  %934 = vmatpush3.bf16.msra.mxu1 %v918_v3  ;;  %v279_v12 = vld [vmem:[%s1334_s9 + $0x20] sm:$0xff]  ;;  %v280_v13 = vld [vmem:[%s1334_s9 + $0x28] sm:$0xff]  ;;  %v281_v14 = vld [vmem:[%s1334_s9 + $0x30] sm:$0xff]  ;;  %s816_s9 = sld [smem:[#allocation7 + $0x1]]  ;;  %s269_s7 = scalar_lea.vmem [#allocation9], %s939_s26 }
  0x63   : > { %861 = vmatprep.subr.mxu0 %v1158_v4  ;;  %933 = vmatprep.subr.mxu1 %v1158_v4  ;;  %v270_v15 = vld [vmem:[%s1454_s1] sm:$0xff]  ;;  %v271_v27 = vld [vmem:[%s1454_s1 + $0x8] sm:$0xff]  ;;  %s821_s15 = sld [smem:[#allocation6 + $0x2]]  ;;  %s940_s12 = smul.u32 768, %s1213_s22 }
  0x64   : > { %s822_s29 = sld [smem:[#allocation7 + $0x2]]  ;;  %s700_s16 = sshll.u32 %s269_s7, 4  ;;  %s1407_s16 = int_to_ptr.vmem [resolvable:$true] %s700_s16 }
  0x65   : > { %s1405_s28 = scalar_lea.hbm %s1458_s5, %s940_s12  ;;  %s687_s22 = scalar_lea.sflag [#allocation4], %s1330_s25 }
  0x66   : > { %862 = vmatpush3.msra.mxu0 %v274_v5  ;;  %935 = vmatpush3.msra.mxu1 %v274_v5  ;;  %v505_v38 = vstv %s422_s17  ;;  %s1075_s10 = scalar_lea.vmem %s1407_s16, 768  ;;  %p1478_p2 = scmp.ne.s32.totalorder %s1466_s30, 0 }
  0x67   : > { %864 = vmatmul.mubr.msk.f32.vlgmr.msra.gmra.mrb[0].mxu0 %vm284_vm1, %v275_v6  ;;  %885 = vmatmul.mubr.msk.f32.vlgmr.msra.gmra.mrb[0].mxu1 %vm284_vm1, %v282_v7  ;;  %v508_v40 = vstv %s423_s14  ;;  %v591_v46 = vstv %s815_s8  ;;  %p1076_p5 = scmp.ne.s32.totalorder %s1407_s16, %s1075_s10  ;;  %s1159_s13 = smov [#allocation9]  }
  0x68   : > { %866 = vmatprep.mubr.msk.f32.mxu0 %vm1157_vm0, %v1158_v4  ;;  %887 = vmatprep.mubr.msk.f32.mxu1 %vm1157_vm0, %v1158_v4  ;;  %v594_v48 = vstv %s816_s9  ;;  %s1079_s17 = sshll.u32 %s1159_s13, 4  ;;  %s1080_s17 = int_to_ptr.vmem [resolvable:$false] %s1079_s17 }
  0x69   : > { %v677_v54 = vstv %s821_s15  ;;  %p1077_p8 = pnand %p1076_p5, %p1478_p2  ;;  %s1081_s14 = scalar_lea.vmem %s1080_s17, 1536 }
  0x6a   : > { %v680_v56 = vstv %s822_s29  ;;  %p1082_p4 = scmp.lt.s32.totalorder %s1407_s16, %s1080_s17  ;;  %p1083_p12 = scmp.lt.s32.totalorder %s1081_s14, %s1075_s10 }
  0x6b   : > { %867 = vmatmul.mubr.msk.f32.gmra.mrb[2].mxu0 %vm284_vm1, %v276_v8  ;;  %888 = vmatmul.mubr.msk.f32.gmra.mrb[2].mxu1 %vm284_vm1, %v283_v9  ;;  %p1078_p10 = pneg %p1077_p8 }
  0x6c   : > { %869 = vmatprep.mubr.msk.f32.mxu0 %vm1157_vm0, %v1158_v4  ;;  %896 = vmatprep.mubr.msk.f32.mxu1 %vm284_vm1, %v270_v15  ;;  %p1084_p0 = por %p1083_p12, %p1082_p4 }
  0x6e   : > { %p1085_p7 = pnand %p1084_p0, %p1078_p10 }
  0x6f   : > { %870 = vmatmul.mubr.msk.f32.gmra.mrb[4].mxu0 %vm284_vm1, %v277_v10 }
  0x70   : > { %872 = vmatprep.mubr.msk.f32.mxu0 %vm1157_vm0, %v1158_v4 }
  0x73   : > { %873 = vmatmul.mubr.msk.f32.gmra.mrb[6].mxu0 %vm284_vm1, %v278_v11 }
  0x74   : > { %875 = vmatprep.mubr.msk.f32.mxu0 %vm1157_vm0, %v1158_v4 }
  0x77   : > { %876 = vmatmul.mubr.msk.f32.gmra.mrb[8].mxu0 %vm284_vm1, %v279_v12 }
  0x78   : > { %878 = vmatprep.mubr.msk.f32.mxu0 %vm1157_vm0, %v1158_v4 }
  0x7b   : > { %879 = vmatmul.mubr.msk.f32.gmra.mrb[10].mxu0 %vm284_vm1, %v280_v13 }
  0x7c   : > { %881 = vmatprep.mubr.msk.f32.mxu0 %vm1157_vm0, %v1158_v4 }
  0x7f   : > { %882 = vmatmul.mubr.msk.f32.gmra.mrb[12].mxu0 %vm284_vm1, %v281_v14 }
 0x13a   : > { %v378_v16 = vpop.f32.mrb[0].mxu0  ;;  %v413_v17 = vpop.f32.mrb[0].mxu1 }
 0x13b   : > { %v865_v18 = vpop.f32.mrb[1].mxu0  ;;  %v886_v19 = vpop.f32.mrb[1].mxu1 }
 0x13e   : > { %v383_v20 = vpop.f32.mrb[2].mxu0  ;;  %v418_v21 = vpop.f32.mrb[2].mxu1 }
 0x13f   : > { %v920_v22 = vpack.c.bf16 %v383_v20, %v378_v16  ;;  %v868_v23 = vpop.f32.mrb[3].mxu0  ;;  %v889_v24 = vpop.f32.mrb[3].mxu1 }
 0x141   : > { %921 = vmatprep.subr.bf16.mxu1 %v920_v22 }
 0x142   : > { %v388_v25 = vpop.f32.mrb[4].mxu0  ;;  %923 = vmatpush3.bf16.msra.mxu1 %v920_v22 }
 0x143   : > { %v871_v26 = vpop.f32.mrb[5].mxu0  ;;  %894 = vmatprep.subr.mxu1 %v388_v25 }
 0x146   : > { %v393_v28 = vpop.f32.mrb[6].mxu0  ;;  %895 = vmatpush3.msra.mxu1 %v388_v25 }
 0x147   : > { %v874_v29 = vpop.f32.mrb[7].mxu0  ;;  %897 = vmatmul.mubr.msk.f32.vlgmr.msra.gmra.mrb[4].mxu1 %vm284_vm1, %v271_v27 }
 0x148   : > { %905 = vmatprep.mubr.msk.f32.mxu1 %vm284_vm1, %v270_v15 }
 0x14a   : > { %v398_v30 = vpop.f32.mrb[8].mxu0 }
 0x14b   : > { %v924_v31 = vpack.c.bf16 %v398_v30, %v393_v28  ;;  %v877_v32 = vpop.f32.mrb[9].mxu0 }
 0x14d   : > { %925 = vmatprep.subr.bf16.mxu1 %v924_v31 }
 0x14e   : > { %v403_v33 = vpop.f32.mrb[10].mxu0  ;;  %927 = vmatpush3.bf16.msra.mxu1 %v924_v31 }
 0x14f   : > { %v880_v34 = vpop.f32.mrb[11].mxu0  ;;  %903 = vmatprep.subr.mxu1 %v403_v33 }
 0x152   : > { %v408_v35 = vpop.f32.mrb[12].mxu0  ;;  %904 = vmatpush3.msra.mxu1 %v403_v33 }
 0x153   : > { %v928_v36 = vpack.c.bf16 %v413_v17, %v408_v35  ;;  %v883_v37 = vpop.f32.mrb[13].mxu0  ;;  %906 = vmatmul.mubr.msk.f32.vlgmr.msra.gmra.mrb[6].mxu1 %vm284_vm1, %v271_v27 }
 0x154   : > { %914 = vmatprep.mubr.msk.f32.mxu1 %vm284_vm1, %v270_v15 }
 0x155   : > { %929 = vmatprep.subr.bf16.mxu1 %v928_v36 }
 0x156   : > { %931 = vmatpush3.bf16.msra.mxu1 %v928_v36 }
 0x157   : > { %912 = vmatprep.subr.mxu1 %v418_v21 }
 0x15a   : > { %913 = vmatpush3.msra.mxu1 %v418_v21 }
 0x15b   : > { %915 = vmatmul.mubr.msk.f32.vlgmr.msra.gmra.mrb[8].mxu1 %vm284_vm1, %v271_v27 }
 0x21a   : > { %v898_v39 = vpop.f32.mrb[4].mxu1 }
 0x21b   : > { %v507_v41 = vmul.f32 %v898_v39, %v505_v38  ;;  %v496_v42 = vpop.f32.mrb[5].mxu1 }
 0x21c   : > { %v506_v43 = vmul.f32 %v505_v38, %v496_v42 }
 0x21d   : > { %v510_v44 = vadd.f32 %v508_v40, %v507_v41 }
 0x21e   : > { %v509_v45 = vadd.f32 %v508_v40, %v506_v43 }
 0x21f   : > { %513 = vst.msk [vmem:[%s269_s7 + $0x8] sm:$0xff] %vm511_vm2, %v510_v44 }
 0x220   : > { %512 = vst.msk [vmem:[%s269_s7] sm:$0xff] %vm511_vm2, %v509_v45 }
 0x226   : > { %v907_v47 = vpop.f32.mrb[6].mxu1 }
 0x227   : > { %v593_v49 = vmul.f32 %v907_v47, %v591_v46  ;;  %v582_v50 = vpop.f32.mrb[7].mxu1 }
 0x228   : > { %v592_v51 = vmul.f32 %v591_v46, %v582_v50 }
 0x229   : > { %v596_v52 = vadd.f32 %v594_v48, %v593_v49 }
 0x22a   : > { %v595_v53 = vadd.f32 %v594_v48, %v592_v51 }
 0x22b   : > { %820 = vst.msk [vmem:[%s269_s7 + $0x18] sm:$0xff] %vm511_vm2, %v596_v52 }
 0x22c   : > { %819 = vst.msk [vmem:[%s269_s7 + $0x10] sm:$0xff] %vm511_vm2, %v595_v53 }
 0x22e   : > { %v916_v55 = vpop.f32.mrb[8].mxu1 }
 0x22f   : > { %v679_v57 = vmul.f32 %v916_v55, %v677_v54  ;;  %v668_v58 = vpop.f32.mrb[9].mxu1 }
 0x230   : > { %v678_v59 = vmul.f32 %v677_v54, %v668_v58 }
 0x231   : > { %v682_v60 = vadd.f32 %v680_v56, %v679_v57 }
 0x232   : > { %v681_v61 = vadd.f32 %v680_v56, %v678_v59 }
 0x233   : > { %826 = vst.msk [vmem:[%s269_s7 + $0x28] sm:$0xff] %vm511_vm2, %v682_v60 }
 0x234   : > { %825 = vst.msk [vmem:[%s269_s7 + $0x20] sm:$0xff] %vm511_vm2, %v681_v61 }
 0x235   : > { %1088 = shalt.err (!%p1085_p7)
}
 0x236   : > { %s1089_s26 = scalar_lea.hbm %s1405_s28, 768  ;;  %s1093_s7 = scalar_lea.hbm %s1458_s5, 1536 }
 0x237   : > { %p1090_p11 = scmp.ne.s32.totalorder %s1405_s28, %s1089_s26  ;;  %p1094_p3 = scmp.lt.u32.totalorder %s1405_s28, %s1458_s5 }
 0x238   : > { %p1095_p9 = scmp.lt.u32.totalorder %s1093_s7, %s1089_s26  ;;  %p1097_p5 = scmp.lt.u32.totalorder %s1089_s26, %s1405_s28 }
 0x239   : > { %p1091_p13 = pnand %p1090_p11, %p1478_p2 }
 0x23a   : > { %p1096_p1 = por %p1095_p9, %p1094_p3 }
 0x23b   : > { %p1092_p6 = pneg %p1091_p13 }
 0x23c   : > { %p1098_p8 = por %p1097_p5, %p1096_p1 }
 0x23e   : > { %p1099_p10 = pnand %p1098_p8, %p1092_p6 }
 0x240   : > { %1102 = shalt.err (!%p1099_p10)
}
 0x241   : > { %s1160_s12 = smov 128   ;;  %s1161_s11 = smov 8  }
 0x242   : > { %951 = dma.vmem_to_hbm [thread:$0]  (%p1478_p2), %s1407_s16, 768, %s1405_s28, %s687_s22, %s1160_s12, %s1160_s12, %s1161_s11  }
 0x243 PF: > { %s715_s23 = sand.u32 1, %s1137_s18   ;;  %p1479_p4 = scmp.ne.s32.totalorder %s1467_s6, 0 }
 0x244   : > { %p1480_p12 = scmp.ge.s32.totalorder %s1149_s21, 2  ;;  %s716_s10 = scalar_lea.sflag [#allocation4], %s715_s23 }
 0x246   : > { %p965_p0 = pnand %p1480_p12, %p1479_p4 }
 0x248   : > { %1132 = dma.done.wait (!%p965_p0), %s716_s10, 768  }
 0x249   : > { %1134 = vsyncadd (!%p965_p0), %s716_s10, 4294966528  ;;  %p20_p7 = scmp.ge.s32.totalorder %s1217_s24, 4   ;;  %s1481_s18 = smov %s1141_s19 }
 0x24a   : > { %s1482_s19 = smov %s1145_s20  ;;  %s1483_s20 = smov %s1229_s27 }
 0x24b   : > { %s1484_s21 = smov %s1217_s24  ;;  %22 = sbr.rel (!%p20_p7) target bundleno = 7 (0x7), region = 96 }
 0x252   :  { %721 = vsyncpa [#allocation3], 1 }
 0x253   :  { %723 = vsyncpa [#allocation3 + $0x1], 1 }
 0x254   :  { %724 = vsyncpa [#allocation4], 1 }
 0x255   :  { %726 = vsyncpa [#allocation4 + $0x1], 1 }
 0x256   :  { %727 = vsyncpa [#allocation5], 1 }
 0x257   :  { %729 = vsyncpa [#allocation5 + $0x1], 1 }
 0x258   :  { %730 = vsyncpa [#allocation8], 1 }

</bundles_post_ra>
